<compile_context>
chip_gen: v7x
topology: tpu7x:2x2x1
jax: 0.10.0
libtpu: 0.0.40
codegen_flags: <defaults>
</compile_context>

<pallas_src>
import functools

import jax
import jax.numpy as jnp
from jax.experimental import pallas as pl
from jax.experimental.pallas import tpu as pltpu

BETA = 0.5   # SegGptLoss(beta)
LANE = 128


def _seggpt_loss_kernel(pred_ref, labels_ref, yes_ref, num_ref, ysum_ref, *,
                        beta, total_rows, block_rows):
    # pred_ref   : (B*C, R, L)  label (second) half only; the size-2 half axis is squeezed away
    # labels_ref : (B*C, R, L)
    # yes_ref    : (B,   R, L)  int8
    # num_ref    : (1, 1, L) f32   per-tile partial numerator (lane-dense store)
    # ysum_ref   : (1, 1, L) f32   per-tile partial sum of yesdata
    BC, R, L = labels_ref.shape
    B = yes_ref.shape[0]

    ragged = (total_rows % block_rows) != 0       # static Python condition
    valid = None
    if ragged:
        row0 = pl.program_id(0) * block_rows
        row_ids = row0 + jax.lax.broadcasted_iota(jnp.int32, (R, L), 0)
        valid = row_ids < total_rows              # last-tile overhang rows are stale garbage

    # Sum of yesdata over batch: integer accumulation, one f32 cast per tile.
    def yes_body(b, acc):
        return acc + yes_ref[b].astype(jnp.int32)
    yes_i = jax.lax.fori_loop(0, B, yes_body, jnp.zeros((R, L), jnp.int32), unroll=True)
    yes_b = yes_i.astype(jnp.float32)             # (R, L)

    # Smooth-L1 accumulated one (R, L) slab at a time over the fused (b, c) axis.
    def bc_body(bc, acc):
        d = pred_ref[bc].astype(jnp.float32) - labels_ref[bc].astype(jnp.float32)
        a = jnp.abs(d)
        if beta > 0.0:
            sl = jnp.where(a < beta, d * d * (0.5 / beta), a - 0.5 * beta)
        else:                                      # PyTorch beta=0 degenerates to pure L1
            sl = a
        return acc + sl
    loss_bc = jax.lax.fori_loop(0, BC, bc_body, jnp.zeros((R, L), jnp.float32),
                                unroll=True)       # (R, L)

    if ragged:
        # `where`-select (not multiply) so stale NaN/Inf bits in the overhang cannot leak.
        loss_bc = jnp.where(valid, loss_bc, 0.0)
        yes_b = jnp.where(valid, yes_b, 0.0)

    # Collapse sublanes once per tile; keep the lane axis dense so the store is a plain vst.
    num_ref[0] = jnp.sum(loss_bc * yes_b, axis=0, keepdims=True)   # (1, L)
    ysum_ref[0] = jnp.sum(yes_b, axis=0, keepdims=True)            # (1, L)


@functools.partial(jax.jit, static_argnames=("beta", "block_rows"))
def seggpt_loss(pred_masks, labels, yesdata, beta=BETA, block_rows=None):
    B, C, H2, W = pred_masks.shape
    H = H2 // 2
    assert H2 == 2 * H, "pred_masks height must be even (blank half + label half)"
    assert labels.shape == (B, C, H, W)
    assert yesdata.shape == (B, 1, H, W)

    S = H * W
    if S % LANE == 0:
        ROWS, LAST = S // LANE, LANE      # lane-dense flattened spatial (free reshape)
    else:
        ROWS, LAST = H, W                 # natural layout; W is the full last dim (always legal)
    BC = B * C

    # Free (contiguous) reshapes only -- no jnp.pad, no materializing copies of pred/labels.
    pred_r = pred_masks.reshape(BC, 2, ROWS, LAST)       # [:, 1] == label (second) half
    labels_r = labels.reshape(BC, ROWS, LAST)
    yes_r = yesdata.astype(jnp.int8).reshape(B, ROWS, LAST)   # tiny; 1 byte/elem HBM traffic

    pred_item = jnp.dtype(pred_masks.dtype).itemsize
    lab_item = jnp.dtype(labels.dtype).itemsize

    # Generation-aware VMEM budget (v7x: 64 MiB physical/TC; v5e/v6e: 128 MiB physical).
    try:
        vmem_cap = int(pltpu.get_tpu_info().vmem_capacity_bytes)
    except Exception:
        vmem_cap = 128 * 1024 * 1024
    if vmem_cap <= 64 * 1024 * 1024:
        budget, vmem_limit = 16 * 1024 * 1024, 40 * 1024 * 1024   # v7x-class
    else:
        budget, vmem_limit = 20 * 1024 * 1024, 56 * 1024 * 1024   # v5e / v6e

    if block_rows is None:
        # Per-row bytes: double-buffered inputs (per-array itemsizes) + f32 slab intermediates.
        per_row_in = BC * LAST * pred_item + BC * LAST * lab_item + B * LAST
        per_row_tmp = 8 * LAST * 4
        row_bytes = 2 * per_row_in + per_row_tmp
        block_rows = min(1024, max(32, (budget // row_bytes) // 32 * 32))
    else:
        block_rows = max(32, (int(block_rows) // 32) * 32)   # multiple of 32: int8 sublane tiling
    if block_rows >= ROWS:
        block_rows = ROWS                                     # single full-extent block
    n_tiles = -(-ROWS // block_rows)                          # ragged tail handled in-kernel

    kernel = functools.partial(_seggpt_loss_kernel, beta=float(beta),
                               total_rows=ROWS, block_rows=block_rows)
    num_part, ysum_part = pl.pallas_call(
        kernel,
        grid=(n_tiles,),
        in_specs=[
            # Squeezed size-2 half axis; block index 1 selects the label (second) half, so the
            # blank half of pred is never fetched from HBM and no in-kernel slice copy exists.
            pl.BlockSpec((BC, pl.Squeezed(), block_rows, LAST), lambda i: (0, 1, i, 0)),
            pl.BlockSpec((BC, block_rows, LAST), lambda i: (0, i, 0)),
            pl.BlockSpec((B, block_rows, LAST), lambda i: (0, i, 0)),
        ],
        out_specs=[
            pl.BlockSpec((1, 1, LAST), lambda i: (i, 0, 0)),
            pl.BlockSpec((1, 1, LAST), lambda i: (i, 0, 0)),
        ],
        out_shape=[
            jax.ShapeDtypeStruct((n_tiles, 1, LAST), jnp.float32),
            jax.ShapeDtypeStruct((n_tiles, 1, LAST), jnp.float32),
        ],
        compiler_params=pltpu.CompilerParams(
            dimension_semantics=("parallel",),
            vmem_limit_bytes=vmem_limit,
        ),
    )(pred_r, labels_r, yes_r)

    # Tiny cross-tile combine + scalar divide in XLA (keeps the grid axis parallel).
    numerator = jnp.sum(num_part)
    yes_total = jnp.sum(ysum_part)
    # Note: all-False yesdata yields 0/0 = NaN, matching PyTorch/reference behavior.
    return numerator / (jnp.float32(C) * yes_total)


def seggpt_loss_reference(pred, labels, yes, beta):
    """Pure-JAX transcription of the PyTorch forward (including its (B,B,...) broadcast)."""
    B, C, H2, W = pred.shape
    H = H2 // 2
    blank = jnp.zeros((B, C, H, W), jnp.float32)
    label_mask = jnp.concatenate([blank, labels.astype(jnp.float32)], axis=2)
    keep = jnp.concatenate(
        [blank, jnp.broadcast_to(yes.astype(jnp.float32), (B, C, H, W))], axis=2
    )
    diff = pred.astype(jnp.float32) - label_mask
    absd = jnp.abs(diff)
    loss = jnp.where(absd < beta, 0.5 * diff * diff / beta, absd - 0.5 * beta)
    loss = loss[None] * keep[:, None]          # (B,B,C,2H,W), as in PyTorch
    return loss.sum() / keep.sum()


if __name__ == "__main__":
    key = jax.random.PRNGKey(0)

    # Config A: lane-dense spatial (S = 64*128); forced 2-tile grid and auto single-tile grid.
    B, C, H, W = 2, 4, 64, 128
    k1, k2, k3, k4 = jax.random.split(key, 4)
    pred_masks = jax.random.normal(k1, (B, C, 2 * H, W), dtype=jnp.float32)
    labels = jax.random.normal(k2, (B, C, H, W), dtype=jnp.float32)
    yesdata = jax.random.bernoulli(k3, 0.5, (B, 1, H, W))   # bool

    ref = jax.block_until_ready(seggpt_loss_reference(pred_masks, labels, yesdata, BETA))
    out_tiled = jax.block_until_ready(seggpt_loss(pred_masks, labels, yesdata, block_rows=32))
    out_auto = jax.block_until_ready(seggpt_loss(pred_masks, labels, yesdata))
    assert jnp.allclose(out_tiled, ref, rtol=1e-4, atol=1e-5), (out_tiled, ref)
    assert jnp.allclose(out_auto, ref, rtol=1e-4, atol=1e-5), (out_auto, ref)

    # Config B: lane-dense but rows (40) not divisible by the tile (32) -> in-kernel tail mask.
    Bb, Cb, Hb, Wb = 2, 2, 40, 128
    ka, kb, kc, kd = jax.random.split(k4, 4)
    predb = jax.random.normal(ka, (Bb, Cb, 2 * Hb, Wb), dtype=jnp.float32)
    labelsb = jax.random.normal(kb, (Bb, Cb, Hb, Wb), dtype=jnp.float32)
    yesb = jax.random.bernoulli(kc, 0.5, (Bb, 1, Hb, Wb))
    refb = jax.block_until_ready(seggpt_loss_reference(predb, labelsb, yesb, BETA))
    outb = jax.block_until_ready(seggpt_loss(predb, labelsb, yesb, block_rows=32))
    assert jnp.allclose(outb, refb, rtol=1e-4, atol=1e-5), (outb, refb)

    # Config C: spatial (8*20=160) not a multiple of 128 -> natural (H, W) layout, no padding.
    Bc, Cc, Hc, Wc = 2, 3, 8, 20
    ke, kf, kg = jax.random.split(kd, 3)
    predc = jax.random.normal(ke, (Bc, Cc, 2 * Hc, Wc), dtype=jnp.float32)
    labelsc = jax.random.normal(kf, (Bc, Cc, Hc, Wc), dtype=jnp.float32)
    yesc = jax.random.bernoulli(kg, 0.5, (Bc, 1, Hc, Wc))
    refc = jax.block_until_ready(seggpt_loss_reference(predc, labelsc, yesc, BETA))
    outc = jax.block_until_ready(seggpt_loss(predc, labelsc, yesc))
    assert jnp.allclose(outc, refc, rtol=1e-4, atol=1e-5), (outc, refc)

    print("KERNEL_OK")
</pallas_src>

<mosaic_0001>
module attributes {stable_mosaic.version = 11 : i64} {
  func.func @_seggpt_loss_kernel(%arg0: i32, %arg1: memref<8x1x32x128xf32, #tpu.memory_space<vmem>>, %arg2: memref<8x32x128xf32, #tpu.memory_space<vmem>>, %arg3: memref<2x32x128xi8, #tpu.memory_space<vmem>>, %arg4: memref<1x1x128xf32, #tpu.memory_space<vmem>>, %arg5: memref<1x1x128xf32, #tpu.memory_space<vmem>>) attributes {dimension_semantics = [#tpu.dimension_semantics<parallel>], iteration_bounds = array<i64: 2>, scalar_prefetch = 0 : i64, scratch_operands = 0 : i64, tpu.core_type = #tpu.core_type<tc>, window_params = [{transform_indices = @transform_0, window_bounds = array<i64: 8, 1, 32, 128>}, {transform_indices = @transform_1, window_bounds = array<i64: 8, 32, 128>}, {transform_indices = @transform_2, window_bounds = array<i64: 2, 32, 128>}, {transform_indices = @transform_3, window_bounds = array<i64: 1, 1, 128>}, {transform_indices = @transform_4, window_bounds = array<i64: 1, 1, 128>}]} {
    %c0_i32 = arith.constant 0 : i32
    %0 = vector.broadcast %c0_i32 : i32 to vector<32x128xi32>
    %c0_i32_0 = arith.constant 0 : i32
    %1 = arith.index_cast %c0_i32_0 : i32 to index
    %c0 = arith.constant 0 : index
    %c0_1 = arith.constant 0 : index
    %2 = vector.load %arg3[%1, %c0, %c0_1] : memref<2x32x128xi8, #tpu.memory_space<vmem>>, vector<1x32x128xi8>
    %3 = vector.shape_cast %2 : vector<1x32x128xi8> to vector<32x128xi8>
    %4 = arith.extsi %3 : vector<32x128xi8> to vector<32x128xi32>
    %5 = arith.addi %0, %4 : vector<32x128xi32>
    %c1_i32 = arith.constant 1 : i32
    %6 = arith.index_cast %c1_i32 : i32 to index
    %c0_2 = arith.constant 0 : index
    %c0_3 = arith.constant 0 : index
    %7 = vector.load %arg3[%6, %c0_2, %c0_3] : memref<2x32x128xi8, #tpu.memory_space<vmem>>, vector<1x32x128xi8>
    %8 = vector.shape_cast %7 : vector<1x32x128xi8> to vector<32x128xi8>
    %9 = arith.extsi %8 : vector<32x128xi8> to vector<32x128xi32>
    %10 = arith.addi %5, %9 : vector<32x128xi32>
    %c2_i32 = arith.constant 2 : i32
    %11 = arith.sitofp %10 : vector<32x128xi32> to vector<32x128xf32>
    %cst = arith.constant 0.000000e+00 : f32
    %12 = vector.broadcast %cst : f32 to vector<32x128xf32>
    %c0_i32_4 = arith.constant 0 : i32
    %13 = arith.index_cast %c0_i32_4 : i32 to index
    %c0_5 = arith.constant 0 : index
    %c0_6 = arith.constant 0 : index
    %c0_7 = arith.constant 0 : index
    %14 = vector.load %arg1[%13, %c0_5, %c0_6, %c0_7] : memref<8x1x32x128xf32, #tpu.memory_space<vmem>>, vector<1x1x32x128xf32>
    %15 = vector.shape_cast %14 : vector<1x1x32x128xf32> to vector<32x128xf32>
    %16 = arith.index_cast %c0_i32_4 : i32 to index
    %c0_8 = arith.constant 0 : index
    %c0_9 = arith.constant 0 : index
    %17 = vector.load %arg2[%16, %c0_8, %c0_9] : memref<8x32x128xf32, #tpu.memory_space<vmem>>, vector<1x32x128xf32>
    %18 = vector.shape_cast %17 : vector<1x32x128xf32> to vector<32x128xf32>
    %19 = arith.subf %15, %18 : vector<32x128xf32>
    %20 = math.absf %19 : vector<32x128xf32>
    %cst_10 = arith.constant 5.000000e-01 : f32
    %21 = vector.broadcast %cst_10 : f32 to vector<32x128xf32>
    %22 = arith.cmpf olt, %20, %21 : vector<32x128xf32>
    %23 = arith.mulf %19, %19 : vector<32x128xf32>
    %cst_11 = arith.constant 1.000000e+00 : f32
    %24 = vector.broadcast %cst_11 : f32 to vector<32x128xf32>
    %25 = arith.mulf %23, %24 : vector<32x128xf32>
    %cst_12 = arith.constant 2.500000e-01 : f32
    %26 = vector.broadcast %cst_12 : f32 to vector<32x128xf32>
    %27 = arith.subf %20, %26 : vector<32x128xf32>
    %28 = arith.select %22, %25, %27 : vector<32x128xi1>, vector<32x128xf32>
    %29 = arith.addf %12, %28 : vector<32x128xf32>
    %c1_i32_13 = arith.constant 1 : i32
    %30 = arith.index_cast %c1_i32_13 : i32 to index
    %c0_14 = arith.constant 0 : index
    %c0_15 = arith.constant 0 : index
    %c0_16 = arith.constant 0 : index
    %31 = vector.load %arg1[%30, %c0_14, %c0_15, %c0_16] : memref<8x1x32x128xf32, #tpu.memory_space<vmem>>, vector<1x1x32x128xf32>
    %32 = vector.shape_cast %31 : vector<1x1x32x128xf32> to vector<32x128xf32>
    %33 = arith.index_cast %c1_i32_13 : i32 to index
    %c0_17 = arith.constant 0 : index
    %c0_18 = arith.constant 0 : index
    %34 = vector.load %arg2[%33, %c0_17, %c0_18] : memref<8x32x128xf32, #tpu.memory_space<vmem>>, vector<1x32x128xf32>
    %35 = vector.shape_cast %34 : vector<1x32x128xf32> to vector<32x128xf32>
    %36 = arith.subf %32, %35 : vector<32x128xf32>
    %37 = math.absf %36 : vector<32x128xf32>
    %cst_19 = arith.constant 5.000000e-01 : f32
    %38 = vector.broadcast %cst_19 : f32 to vector<32x128xf32>
    %39 = arith.cmpf olt, %37, %38 : vector<32x128xf32>
    %40 = arith.mulf %36, %36 : vector<32x128xf32>
    %cst_20 = arith.constant 1.000000e+00 : f32
    %41 = vector.broadcast %cst_20 : f32 to vector<32x128xf32>
    %42 = arith.mulf %40, %41 : vector<32x128xf32>
    %cst_21 = arith.constant 2.500000e-01 : f32
    %43 = vector.broadcast %cst_21 : f32 to vector<32x128xf32>
    %44 = arith.subf %37, %43 : vector<32x128xf32>
    %45 = arith.select %39, %42, %44 : vector<32x128xi1>, vector<32x128xf32>
    %46 = arith.addf %29, %45 : vector<32x128xf32>
    %c2_i32_22 = arith.constant 2 : i32
    %47 = arith.index_cast %c2_i32_22 : i32 to index
    %c0_23 = arith.constant 0 : index
    %c0_24 = arith.constant 0 : index
    %c0_25 = arith.constant 0 : index
    %48 = vector.load %arg1[%47, %c0_23, %c0_24, %c0_25] : memref<8x1x32x128xf32, #tpu.memory_space<vmem>>, vector<1x1x32x128xf32>
    %49 = vector.shape_cast %48 : vector<1x1x32x128xf32> to vector<32x128xf32>
    %50 = arith.index_cast %c2_i32_22 : i32 to index
    %c0_26 = arith.constant 0 : index
    %c0_27 = arith.constant 0 : index
    %51 = vector.load %arg2[%50, %c0_26, %c0_27] : memref<8x32x128xf32, #tpu.memory_space<vmem>>, vector<1x32x128xf32>
    %52 = vector.shape_cast %51 : vector<1x32x128xf32> to vector<32x128xf32>
    %53 = arith.subf %49, %52 : vector<32x128xf32>
    %54 = math.absf %53 : vector<32x128xf32>
    %cst_28 = arith.constant 5.000000e-01 : f32
    %55 = vector.broadcast %cst_28 : f32 to vector<32x128xf32>
    %56 = arith.cmpf olt, %54, %55 : vector<32x128xf32>
    %57 = arith.mulf %53, %53 : vector<32x128xf32>
    %cst_29 = arith.constant 1.000000e+00 : f32
    %58 = vector.broadcast %cst_29 : f32 to vector<32x128xf32>
    %59 = arith.mulf %57, %58 : vector<32x128xf32>
    %cst_30 = arith.constant 2.500000e-01 : f32
    %60 = vector.broadcast %cst_30 : f32 to vector<32x128xf32>
    %61 = arith.subf %54, %60 : vector<32x128xf32>
    %62 = arith.select %56, %59, %61 : vector<32x128xi1>, vector<32x128xf32>
    %63 = arith.addf %46, %62 : vector<32x128xf32>
    %c3_i32 = arith.constant 3 : i32
    %64 = arith.index_cast %c3_i32 : i32 to index
    %c0_31 = arith.constant 0 : index
    %c0_32 = arith.constant 0 : index
    %c0_33 = arith.constant 0 : index
    %65 = vector.load %arg1[%64, %c0_31, %c0_32, %c0_33] : memref<8x1x32x128xf32, #tpu.memory_space<vmem>>, vector<1x1x32x128xf32>
    %66 = vector.shape_cast %65 : vector<1x1x32x128xf32> to vector<32x128xf32>
    %67 = arith.index_cast %c3_i32 : i32 to index
    %c0_34 = arith.constant 0 : index
    %c0_35 = arith.constant 0 : index
    %68 = vector.load %arg2[%67, %c0_34, %c0_35] : memref<8x32x128xf32, #tpu.memory_space<vmem>>, vector<1x32x128xf32>
    %69 = vector.shape_cast %68 : vector<1x32x128xf32> to vector<32x128xf32>
    %70 = arith.subf %66, %69 : vector<32x128xf32>
    %71 = math.absf %70 : vector<32x128xf32>
    %cst_36 = arith.constant 5.000000e-01 : f32
    %72 = vector.broadcast %cst_36 : f32 to vector<32x128xf32>
    %73 = arith.cmpf olt, %71, %72 : vector<32x128xf32>
    %74 = arith.mulf %70, %70 : vector<32x128xf32>
    %cst_37 = arith.constant 1.000000e+00 : f32
    %75 = vector.broadcast %cst_37 : f32 to vector<32x128xf32>
    %76 = arith.mulf %74, %75 : vector<32x128xf32>
    %cst_38 = arith.constant 2.500000e-01 : f32
    %77 = vector.broadcast %cst_38 : f32 to vector<32x128xf32>
    %78 = arith.subf %71, %77 : vector<32x128xf32>
    %79 = arith.select %73, %76, %78 : vector<32x128xi1>, vector<32x128xf32>
    %80 = arith.addf %63, %79 : vector<32x128xf32>
    %c4_i32 = arith.constant 4 : i32
    %81 = arith.index_cast %c4_i32 : i32 to index
    %c0_39 = arith.constant 0 : index
    %c0_40 = arith.constant 0 : index
    %c0_41 = arith.constant 0 : index
    %82 = vector.load %arg1[%81, %c0_39, %c0_40, %c0_41] : memref<8x1x32x128xf32, #tpu.memory_space<vmem>>, vector<1x1x32x128xf32>
    %83 = vector.shape_cast %82 : vector<1x1x32x128xf32> to vector<32x128xf32>
    %84 = arith.index_cast %c4_i32 : i32 to index
    %c0_42 = arith.constant 0 : index
    %c0_43 = arith.constant 0 : index
    %85 = vector.load %arg2[%84, %c0_42, %c0_43] : memref<8x32x128xf32, #tpu.memory_space<vmem>>, vector<1x32x128xf32>
    %86 = vector.shape_cast %85 : vector<1x32x128xf32> to vector<32x128xf32>
    %87 = arith.subf %83, %86 : vector<32x128xf32>
    %88 = math.absf %87 : vector<32x128xf32>
    %cst_44 = arith.constant 5.000000e-01 : f32
    %89 = vector.broadcast %cst_44 : f32 to vector<32x128xf32>
    %90 = arith.cmpf olt, %88, %89 : vector<32x128xf32>
    %91 = arith.mulf %87, %87 : vector<32x128xf32>
    %cst_45 = arith.constant 1.000000e+00 : f32
    %92 = vector.broadcast %cst_45 : f32 to vector<32x128xf32>
    %93 = arith.mulf %91, %92 : vector<32x128xf32>
    %cst_46 = arith.constant 2.500000e-01 : f32
    %94 = vector.broadcast %cst_46 : f32 to vector<32x128xf32>
    %95 = arith.subf %88, %94 : vector<32x128xf32>
    %96 = arith.select %90, %93, %95 : vector<32x128xi1>, vector<32x128xf32>
    %97 = arith.addf %80, %96 : vector<32x128xf32>
    %c5_i32 = arith.constant 5 : i32
    %98 = arith.index_cast %c5_i32 : i32 to index
    %c0_47 = arith.constant 0 : index
    %c0_48 = arith.constant 0 : index
    %c0_49 = arith.constant 0 : index
    %99 = vector.load %arg1[%98, %c0_47, %c0_48, %c0_49] : memref<8x1x32x128xf32, #tpu.memory_space<vmem>>, vector<1x1x32x128xf32>
    %100 = vector.shape_cast %99 : vector<1x1x32x128xf32> to vector<32x128xf32>
    %101 = arith.index_cast %c5_i32 : i32 to index
    %c0_50 = arith.constant 0 : index
    %c0_51 = arith.constant 0 : index
    %102 = vector.load %arg2[%101, %c0_50, %c0_51] : memref<8x32x128xf32, #tpu.memory_space<vmem>>, vector<1x32x128xf32>
    %103 = vector.shape_cast %102 : vector<1x32x128xf32> to vector<32x128xf32>
    %104 = arith.subf %100, %103 : vector<32x128xf32>
    %105 = math.absf %104 : vector<32x128xf32>
    %cst_52 = arith.constant 5.000000e-01 : f32
    %106 = vector.broadcast %cst_52 : f32 to vector<32x128xf32>
    %107 = arith.cmpf olt, %105, %106 : vector<32x128xf32>
    %108 = arith.mulf %104, %104 : vector<32x128xf32>
    %cst_53 = arith.constant 1.000000e+00 : f32
    %109 = vector.broadcast %cst_53 : f32 to vector<32x128xf32>
    %110 = arith.mulf %108, %109 : vector<32x128xf32>
    %cst_54 = arith.constant 2.500000e-01 : f32
    %111 = vector.broadcast %cst_54 : f32 to vector<32x128xf32>
    %112 = arith.subf %105, %111 : vector<32x128xf32>
    %113 = arith.select %107, %110, %112 : vector<32x128xi1>, vector<32x128xf32>
    %114 = arith.addf %97, %113 : vector<32x128xf32>
    %c6_i32 = arith.constant 6 : i32
    %115 = arith.index_cast %c6_i32 : i32 to index
    %c0_55 = arith.constant 0 : index
    %c0_56 = arith.constant 0 : index
    %c0_57 = arith.constant 0 : index
    %116 = vector.load %arg1[%115, %c0_55, %c0_56, %c0_57] : memref<8x1x32x128xf32, #tpu.memory_space<vmem>>, vector<1x1x32x128xf32>
    %117 = vector.shape_cast %116 : vector<1x1x32x128xf32> to vector<32x128xf32>
    %118 = arith.index_cast %c6_i32 : i32 to index
    %c0_58 = arith.constant 0 : index
    %c0_59 = arith.constant 0 : index
    %119 = vector.load %arg2[%118, %c0_58, %c0_59] : memref<8x32x128xf32, #tpu.memory_space<vmem>>, vector<1x32x128xf32>
    %120 = vector.shape_cast %119 : vector<1x32x128xf32> to vector<32x128xf32>
    %121 = arith.subf %117, %120 : vector<32x128xf32>
    %122 = math.absf %121 : vector<32x128xf32>
    %cst_60 = arith.constant 5.000000e-01 : f32
    %123 = vector.broadcast %cst_60 : f32 to vector<32x128xf32>
    %124 = arith.cmpf olt, %122, %123 : vector<32x128xf32>
    %125 = arith.mulf %121, %121 : vector<32x128xf32>
    %cst_61 = arith.constant 1.000000e+00 : f32
    %126 = vector.broadcast %cst_61 : f32 to vector<32x128xf32>
    %127 = arith.mulf %125, %126 : vector<32x128xf32>
    %cst_62 = arith.constant 2.500000e-01 : f32
    %128 = vector.broadcast %cst_62 : f32 to vector<32x128xf32>
    %129 = arith.subf %122, %128 : vector<32x128xf32>
    %130 = arith.select %124, %127, %129 : vector<32x128xi1>, vector<32x128xf32>
    %131 = arith.addf %114, %130 : vector<32x128xf32>
    %c7_i32 = arith.constant 7 : i32
    %132 = arith.index_cast %c7_i32 : i32 to index
    %c0_63 = arith.constant 0 : index
    %c0_64 = arith.constant 0 : index
    %c0_65 = arith.constant 0 : index
    %133 = vector.load %arg1[%132, %c0_63, %c0_64, %c0_65] : memref<8x1x32x128xf32, #tpu.memory_space<vmem>>, vector<1x1x32x128xf32>
    %134 = vector.shape_cast %133 : vector<1x1x32x128xf32> to vector<32x128xf32>
    %135 = arith.index_cast %c7_i32 : i32 to index
    %c0_66 = arith.constant 0 : index
    %c0_67 = arith.constant 0 : index
    %136 = vector.load %arg2[%135, %c0_66, %c0_67] : memref<8x32x128xf32, #tpu.memory_space<vmem>>, vector<1x32x128xf32>
    %137 = vector.shape_cast %136 : vector<1x32x128xf32> to vector<32x128xf32>
    %138 = arith.subf %134, %137 : vector<32x128xf32>
    %139 = math.absf %138 : vector<32x128xf32>
    %cst_68 = arith.constant 5.000000e-01 : f32
    %140 = vector.broadcast %cst_68 : f32 to vector<32x128xf32>
    %141 = arith.cmpf olt, %139, %140 : vector<32x128xf32>
    %142 = arith.mulf %138, %138 : vector<32x128xf32>
    %cst_69 = arith.constant 1.000000e+00 : f32
    %143 = vector.broadcast %cst_69 : f32 to vector<32x128xf32>
    %144 = arith.mulf %142, %143 : vector<32x128xf32>
    %cst_70 = arith.constant 2.500000e-01 : f32
    %145 = vector.broadcast %cst_70 : f32 to vector<32x128xf32>
    %146 = arith.subf %139, %145 : vector<32x128xf32>
    %147 = arith.select %141, %144, %146 : vector<32x128xi1>, vector<32x128xf32>
    %148 = arith.addf %131, %147 : vector<32x128xf32>
    %c8_i32 = arith.constant 8 : i32
    %149 = arith.mulf %148, %11 : vector<32x128xf32>
    %cst_71 = arith.constant dense<0.000000e+00> : vector<128xf32>
    %150 = vector.multi_reduction <add>, %149, %cst_71 [0] : vector<32x128xf32> to vector<128xf32>
    %151 = vector.shape_cast %150 : vector<128xf32> to vector<1x128xf32>
    %c0_72 = arith.constant 0 : index
    %c0_73 = arith.constant 0 : index
    %c0_74 = arith.constant 0 : index
    %152 = vector.load %arg4[%c0_72, %c0_73, %c0_74] : memref<1x1x128xf32, #tpu.memory_space<vmem>>, vector<1x1x128xf32>
    %153 = vector.shape_cast %152 : vector<1x1x128xf32> to vector<1x128xf32>
    %154 = vector.shape_cast %151 : vector<1x128xf32> to vector<1x1x128xf32>
    tpu.vector_store %arg4[%c0_72, %c0_73, %c0_74], %154 {strides = array<i32>} : memref<1x1x128xf32, #tpu.memory_space<vmem>>, vector<1x1x128xf32>,
    %cst_75 = arith.constant dense<0.000000e+00> : vector<128xf32>
    %155 = vector.multi_reduction <add>, %11, %cst_75 [0] : vector<32x128xf32> to vector<128xf32>
    %156 = vector.shape_cast %155 : vector<128xf32> to vector<1x128xf32>
    %c0_76 = arith.constant 0 : index
    %c0_77 = arith.constant 0 : index
    %c0_78 = arith.constant 0 : index
    %157 = vector.load %arg5[%c0_76, %c0_77, %c0_78] : memref<1x1x128xf32, #tpu.memory_space<vmem>>, vector<1x1x128xf32>
    %158 = vector.shape_cast %157 : vector<1x1x128xf32> to vector<1x128xf32>
    %159 = vector.shape_cast %156 : vector<1x128xf32> to vector<1x1x128xf32>
    tpu.vector_store %arg5[%c0_76, %c0_77, %c0_78], %159 {strides = array<i32>} : memref<1x1x128xf32, #tpu.memory_space<vmem>>, vector<1x1x128xf32>,
    return
  }
  func.func @transform_0(%arg0: i32) -> (i32, i32, i32, i32) {
    %c0_i32 = arith.constant 0 : i32
    %c1_i32 = arith.constant 1 : i32
    %c0_i32_0 = arith.constant 0 : i32
    %c0_i32_1 = arith.constant 0 : i32
    return %c0_i32, %c1_i32, %arg0, %c0_i32_0 : i32, i32, i32, i32
  }
  func.func @transform_1(%arg0: i32) -> (i32, i32, i32) {
    %c0_i32 = arith.constant 0 : i32
    %c0_i32_0 = arith.constant 0 : i32
    %c0_i32_1 = arith.constant 0 : i32
    return %c0_i32, %arg0, %c0_i32_0 : i32, i32, i32
  }
  func.func @transform_2(%arg0: i32) -> (i32, i32, i32) {
    %c0_i32 = arith.constant 0 : i32
    %c0_i32_0 = arith.constant 0 : i32
    %c0_i32_1 = arith.constant 0 : i32
    return %c0_i32, %arg0, %c0_i32_0 : i32, i32, i32
  }
  func.func @transform_3(%arg0: i32) -> (i32, i32, i32) {
    %c0_i32 = arith.constant 0 : i32
    %c0_i32_0 = arith.constant 0 : i32
    %c0_i32_1 = arith.constant 0 : i32
    return %arg0, %c0_i32, %c0_i32_0 : i32, i32, i32
  }
  func.func @transform_4(%arg0: i32) -> (i32, i32, i32) {
    %c0_i32 = arith.constant 0 : i32
    %c0_i32_0 = arith.constant 0 : i32
    %c0_i32_1 = arith.constant 0 : i32
    return %arg0, %c0_i32, %c0_i32_0 : i32, i32, i32
  }
}

</mosaic_0001>

<bundles_post_ra>
// kernel: seggpt_loss.1
= control target key start
LH: loop header
LB: loop body
LE: loop exit
PB: predicated region body
PF: predicated region fallthrough
CT: control target
= control target key end

     0   :  { %10 = vsyncpa [#allocation3], 0  ;;  %s1499_s0 = inlined_call_operand.hbm [shape: f32[8,2,64,128], index: 0, kind: input, shape index: {}]   ;;  %s1500_s1 = inlined_call_operand.hbm [shape: f32[8,64,128], index: 1, kind: input, shape index: {}]   ;;  %s1501_s2 = inlined_call_operand.vmem [shape: s8[2,64,128], index: 2, kind: input, shape index: {}]   ;;  %s1502_s3 = inlined_call_operand.vmem [shape: f32[2,1,128], index: 3, kind: output, shape index: {0}]   ;;  %s1503_s4 = inlined_call_operand.vmem [shape: f32[2,1,128], index: 4, kind: output, shape index: {1}]  }
   0x1   :  { %12 = vsyncpa [#allocation3 + $0x1], 0 }
   0x2   :  { %13 = vsyncpa [#allocation5], 0 }
   0x3   :  { %15 = vsyncpa [#allocation5 + $0x1], 0  ;;  %s1097_s15 = smov 0   ;;  %s1099_s16 = smov 0  }
   0x4   :  { %s1101_s17 = smov 0   ;;  %s1103_s18 = smov 0  }
   0x5 LB: > { %s1116_s19 = sadd.s32 4294967295, %s1058_s18   ;;  %s1119_s20 = sadd.s32 1, %s1058_s18   ;;  %s1058_s18 = sphi %s1103_s18, %s1571_s18   ;;  %s1054_s17 = sphi %s1101_s17, %s1570_s17   ;;  %s1050_s16 = sphi %s1099_s16, %s1569_s16   ;;  %s1046_s15 = sphi %s1097_s15, %s1568_s15  }
   0x6   : > { %s25_s21 = ssub.s32 %s1058_s18, %s1119_s20  ;;  %s28_s22 = sadd.s32 1, %s1054_s17 }
   0x7   : > { %p26_p0 = scmp.eq.s32.totalorder %s25_s21, 0  ;;  %p35_p1 = scmp.ne.s32.totalorder %s1054_s17, %s1050_s16 }
   0x8   : > { %p36_p2 = scmp.eq.s32.totalorder %s1058_s18, 0  ;;  %p41_p3 = scmp.ne.s32.totalorder %s1050_s16, %s1046_s15 }
   0x9   : > { %s1129_s23 = scalar_select %p26_p0, %s1054_s17, %s28_s22  }
   0xa   : > { %p1131_p4 = por %p36_p2, %p35_p1  ;;  %p42_p5 = scmp.eq.s32.totalorder %s1116_s19, 0 }
   0xb   : > { %p848_p7 = scmp.ge.s32.totalorder %s1058_s18, 2 }
   0xc   : > { %p1136_p6 = por %p42_p5, %p41_p3 }
   0xd   : > { %165 = sbr.rel (%p848_p7) target bundleno = 51 (0x33), region = 16 }
  0x14   : > { %s1142_s26 = sand.u32 1, %s1054_s17   ;;  %s956_s27 = sshll.u32 %s1058_s18, 9 }
  0x15   : > { %s849_s28 = sshll.u32 %s1142_s26, 8  ;;  %s759_s5 = scalar_lea.hbm %s1499_s0, %s956_s27 }
  0x16   : > { %s760_s6 = scalar_lea.hbm %s759_s5, 1024  ;;  %s173_s8 = scalar_lea.vmem [#allocation2], %s849_s28 }
  0x17   : > { %s958_s7 = scalar_select %p1131_p4, [#allocation0], [#allocation11] }
  0x18   : > { %s193_s9 = sshll.u32 %s173_s8, 4  ;;  %s1060_s11 = smov 2048   ;;  %s194_s9 = int_to_ptr.vmem [resolvable:$true] %s193_s9 }
  0x19   : > { %s185_s10 = sld [smem:[%s958_s7]]   ;;  %s1061_s12 = smov 512  }
  0x1a   : > { %959 = sst [smem:[#allocation8]] (%p1131_p4), %s1060_s11  ;;  %s1062_s13 = smov 4  }
  0x1b   : > { %960 = sst [smem:[#allocation8 + $0x1]] (%p1131_p4), %s1061_s12  ;;  %s1063_s14 = smov 128  }
  0x1c   : > { %961 = sst [smem:[#allocation8 + $0x2]] (%p1131_p4), %s1062_s13  ;;  %s1064_s21 = smov 8  }
  0x1d   : > { %962 = sst [smem:[#allocation8 + $0x3]] (%p1131_p4), %s1063_s14  ;;  %s170_s29 = scalar_lea.sflag [#allocation3], %s1142_s26 }
  0x1e   : > { %963 = sst [smem:[#allocation8 + $0x4]] (%p1131_p4), %s1063_s14  ;;  %s1065_s30 = smov [#allocation7]  }
  0x1f   : > { %s852_s15 = sshll.u32 %s185_s10, 26  ;;  %964 = sst [smem:[#allocation8 + $0x5]] (%p1131_p4), %s1064_s21 }
  0x20   : > { %s853_s22 = sadd.s32 134217728, %s852_s15 }
  0x21   : > { %965 = dma.general (%p1131_p4), %s760_s6, 4096, %s194_s9, %s170_s29, %s1065_s30, [#allocation8], %s853_s22, 0  }
  0x22   : > { %s226_s8 = scalar_lea.hbm %s1500_s1, %s956_s27  ;;  %s220_s11 = scalar_lea.vmem [#allocation4], %s849_s28 }
  0x23   : > { %s966_s10 = scalar_select %p1131_p4, [#allocation0], [#allocation12] }
  0x24   : > { %s239_s12 = sshll.u32 %s220_s11, 4  ;;  %s1066_s14 = smov 1024   ;;  %s240_s12 = int_to_ptr.vmem [resolvable:$true] %s239_s12 }
  0x25   : > { %s231_s13 = sld [smem:[%s966_s10]]   ;;  %s1067_s6 = smov 512  }
  0x26   : > { %967 = sst [smem:[#allocation10]] (%p1131_p4), %s1066_s14  ;;  %s1068_s9 = smov 4  }
  0x27   : > { %968 = sst [smem:[#allocation10 + $0x1]] (%p1131_p4), %s1067_s6  ;;  %s1069_s15 = smov 128  }
  0x28   : > { %969 = sst [smem:[#allocation10 + $0x2]] (%p1131_p4), %s1068_s9  ;;  %s1070_s28 = smov 8  }
  0x29   : > { %970 = sst [smem:[#allocation10 + $0x3]] (%p1131_p4), %s1069_s15  ;;  %s217_s22 = scalar_lea.sflag [#allocation5], %s1142_s26 }
  0x2a   : > { %971 = sst [smem:[#allocation10 + $0x4]] (%p1131_p4), %s1069_s15  ;;  %s1071_s29 = smov [#allocation9]  }
  0x2b   : > { %s857_s27 = sshll.u32 %s231_s13, 26  ;;  %972 = sst [smem:[#allocation10 + $0x5]] (%p1131_p4), %s1070_s28 }
  0x2c   : > { %s858_s21 = sadd.s32 134217728, %s857_s27  ;;  %261 = sbr.rel (!%p1131_p4) target bundleno = 51 (0x33), region = 28 }
  0x2d   : > { %973 = dma.general (%p1131_p4), %s226_s8, 4096, %s240_s12, %s217_s22, %s1071_s29, [#allocation10], %s858_s21, 0  }
  0x2e   : > { %s859_s30 = sshll.u32 (%p1131_p4), %s1142_s26, 4  ;;  %s860_s5 = sshll.u32 (%p1131_p4), %s1058_s18, 3 }
  0x2f   : > { %s267_s11 = scalar_lea.vmem (%p1131_p4), %s1501_s2, %s860_s5  ;;  %s265_s13 = scalar_lea.vmem (%p1131_p4), [#allocation6], %s859_s30 }
  0x30   : > { %v297_v0 = vld [vmem:[%s267_s11] sm:$0xff] (%p1131_p4)  ;;  %v299_v1 = vld [vmem:[%s267_s11 + $0x10] sm:$0xff] (%p1131_p4) }
  0x31   : > { %298 = vst [vmem:[%s265_s13] sm:$0xff] (%p1131_p4), %v297_v0  ;;  %300 = vst [vmem:[%s265_s13 + $0x8] sm:$0xff] (%p1131_p4), %v299_v1 }
  0x33 PF: > { %p861_p8 = scmp.ge.s32.totalorder %s1058_s18, 1  ;;  %p305_p9 = scmp.lt.s32.totalorder %s1058_s18, 3 }
  0x35   : > { %p306_p10 = pnand %p861_p8, %p305_p9 }
  0x36   : > { %s311_s24 = sand.u32 (!%p306_p10), 1, %s1050_s16  }
  0x37   : > { %309 = sbr.rel (%p306_p10) target bundleno = 149 (0x95), region = 66  ;;  %s862_s26 = sshll.u32 (!%p306_p10), %s311_s24, 8 }
  0x38   : > { %s312_s8 = scalar_lea.sflag (!%p306_p10), [#allocation3], %s311_s24  ;;  %s1196_s12 = scalar_lea.vmem (!%p306_p10), [#allocation2], %s862_s26 }
  0x3e   : > { %1037 = dma.done.wait (%p1136_p6), %s312_s8, 4096  }
  0x3f   : > { %1039 = vsyncadd (%p1136_p6), %s312_s8, 4294963200  ;;  %s321_s14 = scalar_lea.sflag [#allocation5], %s311_s24  ;;  %s1202_s6 = scalar_lea.vmem [#allocation4], %s862_s26 }
  0x40   : > { %1041 = dma.done.wait (%p1136_p6), %s321_s14, 4096  }
  0x41   : > { %1043 = vsyncadd (%p1136_p6), %s321_s14, 4294963200  ;;  %s864_s18 = sshll.u32 %s311_s24, 4  ;;  %v393_v4 = vld [vmem:[%s1196_s12] sm:$0xff]  ;;  %v394_v9 = vld [vmem:[%s1196_s12 + $0x8] sm:$0xff]  ;;  %p368_p11 = scmp.lt.s32.totalorder %s1116_s19, 1 }
  0x42   : > { %s332_s9 = scalar_lea.vmem [#allocation6], %s864_s18  ;;  %v395_v10 = vld [vmem:[%s1196_s12 + $0x10] sm:$0xff]  ;;  %v396_v11 = vld [vmem:[%s1196_s12 + $0x18] sm:$0xff]  ;;  %v397_v16 = vld [vmem:[%s1202_s6] sm:$0xff] }
  0x43   : > { %v374_v2 = vld [vmem:[%s332_s9] sm:$0xff]  ;;  %v865_v3 = vld [vmem:[%s332_s9 + $0x8] sm:$0xff]  ;;  %v401_v20 = vsub.f32 %v393_v4, %v397_v16  ;;  %s1573_s19 = smov (!%p368_p11, %s1116_s19), 1 }
  0x44   : > { %v375_v5 = vunpack.c.0.s8 %v374_v2  ;;  %v376_v6 = vunpack.c.1.s8 %v374_v2  ;;  %v377_v7 = vunpack.c.2.s8 %v374_v2  ;;  %v378_v8 = vunpack.c.3.s8 %v374_v2  ;;  %v398_v17 = vld [vmem:[%s1202_s6 + $0x8] sm:$0xff]  ;;  %v399_v18 = vld [vmem:[%s1202_s6 + $0x10] sm:$0xff]  ;;  %v400_v19 = vld [vmem:[%s1202_s6 + $0x18] sm:$0xff]  ;;  %s373_s27 = scalar_lea.vmem %s1503_s4, %s1573_s19  ;;  %s370_s22 = scalar_lea.vmem %s1502_s3, %s1573_s19 }
  0x45   : > { %v381_v12 = vunpack.c.0.s8 %v865_v3  ;;  %v382_v13 = vunpack.c.1.s8 %v865_v3  ;;  %v383_v14 = vunpack.c.2.s8 %v865_v3  ;;  %v384_v15 = vunpack.c.3.s8 %v865_v3  ;;  %v870_v29 = vld [vmem:[%s1196_s12 + $0x20] sm:$0xff]  ;;  %v871_v30 = vld [vmem:[%s1196_s12 + $0x28] sm:$0xff]  ;;  %v872_v35 = vld [vmem:[%s1196_s12 + $0x30] sm:$0xff] }
  0x46   : > { %v402_v21 = vsub.f32 %v394_v9, %v398_v17  ;;  %v403_v22 = vsub.f32 %v395_v10, %v399_v18  ;;  %v404_v25 = vsub.f32 %v396_v11, %v400_v19  ;;  %v405_v26 = vand.u32 2147483647, %v401_v20  ;;  %v874_v36 = vld [vmem:[%s1202_s6 + $0x20] sm:$0xff]  ;;  %v875_v37 = vld [vmem:[%s1202_s6 + $0x28] sm:$0xff]  ;;  %v876_v42 = vld [vmem:[%s1202_s6 + $0x30] sm:$0xff] }
  0x47   : > { %v1216_v23 = vadd.s32 %v381_v12, %v375_v5  ;;  %v1218_v24 = vadd.s32 %v382_v13, %v376_v6  ;;  %v1222_v31 = vadd.s32 %v383_v14, %v377_v7  ;;  %v1224_v32 = vadd.s32 %v384_v15, %v378_v8  ;;  %v873_v47 = vld [vmem:[%s1196_s12 + $0x38] sm:$0xff]  ;;  %v882_v61 = vld [vmem:[%s1196_s12 + $0x40] sm:$0xff]  ;;  %v883_v62 = vld [vmem:[%s1196_s12 + $0x48] sm:$0xff] }
  0x48   : > { %v406_v27 = vand.u32 2147483647, %v402_v21  ;;  %v407_v28 = vand.u32 2147483647, %v403_v22  ;;  %v408_v38 = vand.u32 2147483647, %v404_v25  ;;  %v413_v43 = vmul.f32 %v401_v20, %v401_v20 }
  0x49   : > { %v389_v33 = vcvt.s32.f32 %v1216_v23  ;;  %v390_v34 = vcvt.s32.f32 %v1218_v24  ;;  %vm1231_vm0 = vcmp.lt.f32.partialorder %v405_v26, 0.5  ;;  %v414_v44 = vmul.f32 %v402_v21, %v402_v21  ;;  %v877_v48 = vld [vmem:[%s1202_s6 + $0x38] sm:$0xff]  ;;  %v884_v63 = vld [vmem:[%s1196_s12 + $0x50] sm:$0xff]  ;;  %v886_v8 = vld [vmem:[%s1202_s6 + $0x40] sm:$0xff] }
  0x4a   : > { %vm1235_vm1 = vcmp.lt.f32.partialorder %v406_v27, 0.5  ;;  %vm1239_vm2 = vcmp.lt.f32.partialorder %v407_v28, 0.5  ;;  %v415_v45 = vmul.f32 %v403_v22, %v403_v22  ;;  %v416_v46 = vmul.f32 %v404_v25, %v404_v25  ;;  %v887_v9 = vld [vmem:[%s1202_s6 + $0x48] sm:$0xff]  ;;  %v888_v10 = vld [vmem:[%s1202_s6 + $0x50] sm:$0xff]  ;;  %v885_v15 = vld [vmem:[%s1196_s12 + $0x58] sm:$0xff] }
  0x4b   : > { %vm1246_vm3 = vcmp.lt.f32.partialorder %v408_v38, 0.5  ;;  %v866_v50 = vadd.f32 -0.25, %v405_v26  ;;  %v867_v51 = vadd.f32 -0.25, %v406_v27  ;;  %v868_v52 = vadd.f32 -0.25, %v407_v28  ;;  %v889_v16 = vld [vmem:[%s1202_s6 + $0x58] sm:$0xff]  ;;  %v894_v39 = vld [vmem:[%s1196_s12 + $0x60] sm:$0xff] }
  0x4c   : > { %v869_v53 = vadd.f32 -0.25, %v408_v38  ;;  %v439_v54 = vsub.f32 %v870_v29, %v874_v36  ;;  %v440_v55 = vsub.f32 %v871_v30, %v875_v37  ;;  %v441_v56 = vsub.f32 %v872_v35, %v876_v42  ;;  %v895_v40 = vld [vmem:[%s1196_s12 + $0x68] sm:$0xff]  ;;  %v896_v41 = vld [vmem:[%s1196_s12 + $0x70] sm:$0xff]  ;;  %v906_v11 = vld [vmem:[%s1196_s12 + $0x80] sm:$0xff] }
  0x4d   : > { %v421_v57 = vsel %vm1231_vm0, %v413_v43, %v866_v50  ;;  %v422_v58 = vsel %vm1235_vm1, %v414_v44, %v867_v51  ;;  %v423_v59 = vsel %vm1239_vm2, %v415_v45, %v868_v52  ;;  %v442_v60 = vsub.f32 %v873_v47, %v877_v48  ;;  %v898_v50 = vld [vmem:[%s1202_s6 + $0x60] sm:$0xff]  ;;  %v899_v51 = vld [vmem:[%s1202_s6 + $0x68] sm:$0xff]  ;;  %v900_v52 = vld [vmem:[%s1202_s6 + $0x70] sm:$0xff] }
  0x4e   : > { %v424_v0 = vsel %vm1246_vm3, %v416_v46, %v869_v53  ;;  %v443_v1 = vand.u32 2147483647, %v439_v54  ;;  %v444_v2 = vand.u32 2147483647, %v440_v55  ;;  %v445_v3 = vand.u32 2147483647, %v441_v56 }
  0x4f   : > { %v446_v4 = vand.u32 2147483647, %v442_v60  ;;  %v451_v5 = vmul.f32 %v439_v54, %v439_v54  ;;  %v452_v6 = vmul.f32 %v440_v55, %v440_v55  ;;  %v453_v7 = vmul.f32 %v441_v56, %v441_v56  ;;  %v907_v12 = vld [vmem:[%s1196_s12 + $0x88] sm:$0xff]  ;;  %v908_v13 = vld [vmem:[%s1196_s12 + $0x90] sm:$0xff]  ;;  %v918_v53 = vld [vmem:[%s1196_s12 + $0xa0] sm:$0xff] }
  0x50   : > { %vm1264_vm4 = vcmp.lt.f32.partialorder %v443_v1, 0.5  ;;  %vm1268_vm5 = vcmp.lt.f32.partialorder %v444_v2, 0.5  ;;  %vm1272_vm6 = vcmp.lt.f32.partialorder %v445_v3, 0.5  ;;  %v454_v14 = vmul.f32 %v442_v60, %v442_v60  ;;  %v919_v54 = vld [vmem:[%s1196_s12 + $0xa8] sm:$0xff]  ;;  %v920_v55 = vld [vmem:[%s1196_s12 + $0xb0] sm:$0xff] }
  0x51   : > { %vm1278_vm7 = vcmp.lt.f32.partialorder %v446_v4, 0.5  ;;  %v878_v18 = vadd.f32 -0.25, %v443_v1  ;;  %v879_v19 = vadd.f32 -0.25, %v444_v2  ;;  %v880_v20 = vadd.f32 -0.25, %v445_v3 }
  0x52   : > { %v881_v21 = vadd.f32 -0.25, %v446_v4  ;;  %v477_v22 = vsub.f32 %v882_v61, %v886_v8  ;;  %v478_v25 = vsub.f32 %v883_v62, %v887_v9  ;;  %v479_v26 = vsub.f32 %v884_v63, %v888_v10 }
  0x53   : > { %v459_v27 = vsel %vm1264_vm4, %v451_v5, %v878_v18  ;;  %v460_v28 = vsel %vm1268_vm5, %v452_v6, %v879_v19  ;;  %v461_v29 = vsel %vm1272_vm6, %v453_v7, %v880_v20  ;;  %v480_v30 = vsub.f32 %v885_v15, %v889_v16 }
  0x54   : > { %v462_v35 = vsel %vm1278_vm7, %v454_v14, %v881_v21  ;;  %v463_v36 = vadd.f32 %v459_v27, %v421_v57  ;;  %v464_v37 = vadd.f32 %v460_v28, %v422_v58  ;;  %v465_v38 = vadd.f32 %v461_v29, %v423_v59  ;;  %v897_v57 = vld [vmem:[%s1196_s12 + $0x78] sm:$0xff]  ;;  %v930_v27 = vld [vmem:[%s1196_s12 + $0xc0] sm:$0xff]  ;;  %v931_v28 = vld [vmem:[%s1196_s12 + $0xc8] sm:$0xff] }
  0x55   : > { %v466_v42 = vadd.f32 %v462_v35, %v424_v0  ;;  %v481_v43 = vand.u32 2147483647, %v477_v22  ;;  %v482_v44 = vand.u32 2147483647, %v478_v25  ;;  %v483_v45 = vand.u32 2147483647, %v479_v26 }
  0x56   : > { %v484_v46 = vand.u32 2147483647, %v480_v30  ;;  %v489_v47 = vmul.f32 %v477_v22, %v477_v22  ;;  %v490_v48 = vmul.f32 %v478_v25, %v478_v25  ;;  %v491_v49 = vmul.f32 %v479_v26, %v479_v26  ;;  %v901_v58 = vld [vmem:[%s1202_s6 + $0x78] sm:$0xff]  ;;  %v910_v22 = vld [vmem:[%s1202_s6 + $0x80] sm:$0xff]  ;;  %v911_v25 = vld [vmem:[%s1202_s6 + $0x88] sm:$0xff] }
  0x57   : > { %vm1296_vm8 = vcmp.lt.f32.partialorder %v481_v43, 0.5  ;;  %vm1300_vm9 = vcmp.lt.f32.partialorder %v482_v44, 0.5  ;;  %vm1304_vm10 = vcmp.lt.f32.partialorder %v483_v45, 0.5  ;;  %v492_v56 = vmul.f32 %v480_v30, %v480_v30  ;;  %v912_v26 = vld [vmem:[%s1202_s6 + $0x90] sm:$0xff]  ;;  %v909_v35 = vld [vmem:[%s1196_s12 + $0x98] sm:$0xff] }
  0x58   : > { %vm1310_vm11 = vcmp.lt.f32.partialorder %v484_v46, 0.5  ;;  %v890_v60 = vadd.f32 -0.25, %v481_v43  ;;  %v891_v61 = vadd.f32 -0.25, %v482_v44  ;;  %v892_v62 = vadd.f32 -0.25, %v483_v45  ;;  %v932_v29 = vld [vmem:[%s1196_s12 + $0xd0] sm:$0xff] }
  0x59   : > { %v893_v63 = vadd.f32 -0.25, %v484_v46  ;;  %v515_v0 = vsub.f32 %v894_v39, %v898_v50  ;;  %v516_v1 = vsub.f32 %v895_v40, %v899_v51  ;;  %v517_v2 = vsub.f32 %v896_v41, %v900_v52 }
  0x5a   : > { %v497_v3 = vsel %vm1296_vm8, %v489_v47, %v890_v60  ;;  %v498_v4 = vsel %vm1300_vm9, %v490_v48, %v891_v61  ;;  %v499_v5 = vsel %vm1304_vm10, %v491_v49, %v892_v62  ;;  %v518_v6 = vsub.f32 %v897_v57, %v901_v58 }
  0x5b   : > { %v500_v7 = vsel %vm1310_vm11, %v492_v56, %v893_v63  ;;  %v501_v8 = vadd.f32 %v497_v3, %v463_v36  ;;  %v502_v9 = vadd.f32 %v498_v4, %v464_v37  ;;  %v503_v10 = vadd.f32 %v499_v5, %v465_v38  ;;  %v913_v36 = vld [vmem:[%s1202_s6 + $0x98] sm:$0xff]  ;;  %v942_v3 = vld [vmem:[%s1196_s12 + $0xe0] sm:$0xff]  ;;  %v943_v4 = vld [vmem:[%s1196_s12 + $0xe8] sm:$0xff] }
  0x5c   : > { %v504_v14 = vadd.f32 %v500_v7, %v466_v42  ;;  %v519_v15 = vand.u32 2147483647, %v515_v0  ;;  %v520_v16 = vand.u32 2147483647, %v516_v1  ;;  %v521_v17 = vand.u32 2147483647, %v517_v2 }
  0x5d   : > { %v522_v18 = vand.u32 2147483647, %v518_v6  ;;  %v527_v19 = vmul.f32 %v515_v0, %v515_v0  ;;  %v528_v20 = vmul.f32 %v516_v1, %v516_v1  ;;  %v529_v21 = vmul.f32 %v517_v2, %v517_v2  ;;  %v922_v0 = vld [vmem:[%s1202_s6 + $0xa0] sm:$0xff]  ;;  %v923_v1 = vld [vmem:[%s1202_s6 + $0xa8] sm:$0xff]  ;;  %v924_v2 = vld [vmem:[%s1202_s6 + $0xb0] sm:$0xff] }
  0x5e   : > { %vm1328_vm12 = vcmp.lt.f32.partialorder %v519_v15, 0.5  ;;  %vm1332_vm13 = vcmp.lt.f32.partialorder %v520_v16, 0.5  ;;  %vm1336_vm14 = vcmp.lt.f32.partialorder %v521_v17, 0.5  ;;  %v530_v30 = vmul.f32 %v518_v6, %v518_v6  ;;  %v921_v7 = vld [vmem:[%s1196_s12 + $0xb8] sm:$0xff]  ;;  %v944_v5 = vld [vmem:[%s1196_s12 + $0xf0] sm:$0xff] }
  0x5f   : > { %vm1342_vm15 = vcmp.lt.f32.partialorder %v522_v18, 0.5  ;;  %v902_v38 = vadd.f32 -0.25, %v519_v15  ;;  %v903_v39 = vadd.f32 -0.25, %v520_v16  ;;  %v904_v40 = vadd.f32 -0.25, %v521_v17 }
  0x60   : > { %v905_v41 = vadd.f32 -0.25, %v522_v18  ;;  %v553_v42 = vsub.f32 %v906_v11, %v910_v22  ;;  %v554_v43 = vsub.f32 %v907_v12, %v911_v25  ;;  %v555_v44 = vsub.f32 %v908_v13, %v912_v26 }
  0x61   : > { %v535_v45 = vsel %vm1328_vm12, %v527_v19, %v902_v38  ;;  %v536_v46 = vsel %vm1332_vm13, %v528_v20, %v903_v39  ;;  %v537_v47 = vsel %vm1336_vm14, %v529_v21, %v904_v40  ;;  %v556_v48 = vsub.f32 %v909_v35, %v913_v36 }
  0x62   : > { %v538_v49 = vsel %vm1342_vm15, %v530_v30, %v905_v41  ;;  %v539_v50 = vadd.f32 %v535_v45, %v501_v8  ;;  %v540_v51 = vadd.f32 %v536_v46, %v502_v9  ;;  %v541_v52 = vadd.f32 %v537_v47, %v503_v10  ;;  %v925_v8 = vld [vmem:[%s1202_s6 + $0xb8] sm:$0xff] }
  0x63   : > { %v542_v56 = vadd.f32 %v538_v49, %v504_v14  ;;  %v557_v57 = vand.u32 2147483647, %v553_v42  ;;  %v558_v58 = vand.u32 2147483647, %v554_v43  ;;  %v559_v59 = vand.u32 2147483647, %v555_v44 }
  0x64   : > { %v560_v60 = vand.u32 2147483647, %v556_v48  ;;  %v565_v61 = vmul.f32 %v553_v42, %v553_v42  ;;  %v566_v62 = vmul.f32 %v554_v43, %v554_v43  ;;  %v567_v63 = vmul.f32 %v555_v44, %v555_v44  ;;  %v934_v42 = vld [vmem:[%s1202_s6 + $0xc0] sm:$0xff]  ;;  %v935_v43 = vld [vmem:[%s1202_s6 + $0xc8] sm:$0xff]  ;;  %v936_v44 = vld [vmem:[%s1202_s6 + $0xd0] sm:$0xff] }
  0x65   : > { %vm1360_vm0 = vcmp.lt.f32.partialorder %v557_v57, 0.5  ;;  %vm1364_vm1 = vcmp.lt.f32.partialorder %v558_v58, 0.5  ;;  %vm1368_vm2 = vcmp.lt.f32.partialorder %v559_v59, 0.5  ;;  %v568_v6 = vmul.f32 %v556_v48, %v556_v48  ;;  %v933_v49 = vld [vmem:[%s1196_s12 + $0xd8] sm:$0xff] }
  0x66   : > { %vm1374_vm3 = vcmp.lt.f32.partialorder %v560_v60, 0.5  ;;  %v914_v10 = vadd.f32 -0.25, %v557_v57  ;;  %v915_v11 = vadd.f32 -0.25, %v558_v58  ;;  %v916_v12 = vadd.f32 -0.25, %v559_v59 }
  0x67   : > { %v917_v13 = vadd.f32 -0.25, %v560_v60  ;;  %v591_v14 = vsub.f32 %v918_v53, %v922_v0  ;;  %v592_v15 = vsub.f32 %v919_v54, %v923_v1  ;;  %v593_v16 = vsub.f32 %v920_v55, %v924_v2 }
  0x68   : > { %v573_v17 = vsel %vm1360_vm0, %v565_v61, %v914_v10  ;;  %v574_v18 = vsel %vm1364_vm1, %v566_v62, %v915_v11  ;;  %v575_v19 = vsel %vm1368_vm2, %v567_v63, %v916_v12  ;;  %v594_v20 = vsub.f32 %v921_v7, %v925_v8 }
  0x69   : > { %v576_v21 = vsel %vm1374_vm3, %v568_v6, %v917_v13  ;;  %v577_v22 = vadd.f32 %v573_v17, %v539_v50  ;;  %v578_v25 = vadd.f32 %v574_v18, %v540_v51  ;;  %v579_v26 = vadd.f32 %v575_v19, %v541_v52  ;;  %v937_v50 = vld [vmem:[%s1202_s6 + $0xd8] sm:$0xff] }
  0x6a   : > { %v580_v30 = vadd.f32 %v576_v21, %v542_v56  ;;  %v595_v35 = vand.u32 2147483647, %v591_v14  ;;  %v596_v36 = vand.u32 2147483647, %v592_v15  ;;  %v597_v37 = vand.u32 2147483647, %v593_v16 }
  0x6b   : > { %v598_v38 = vand.u32 2147483647, %v594_v20  ;;  %v603_v39 = vmul.f32 %v591_v14, %v591_v14  ;;  %v604_v40 = vmul.f32 %v592_v15, %v592_v15  ;;  %v605_v41 = vmul.f32 %v593_v16, %v593_v16  ;;  %v946_v14 = vld [vmem:[%s1202_s6 + $0xe0] sm:$0xff]  ;;  %v947_v15 = vld [vmem:[%s1202_s6 + $0xe8] sm:$0xff]  ;;  %v948_v16 = vld [vmem:[%s1202_s6 + $0xf0] sm:$0xff] }
  0x6c   : > { %vm1392_vm4 = vcmp.lt.f32.partialorder %v595_v35, 0.5  ;;  %vm1396_vm5 = vcmp.lt.f32.partialorder %v596_v36, 0.5  ;;  %vm1400_vm6 = vcmp.lt.f32.partialorder %v597_v37, 0.5  ;;  %v606_v48 = vmul.f32 %v594_v20, %v594_v20  ;;  %v945_v21 = vld [vmem:[%s1196_s12 + $0xf8] sm:$0xff] }
  0x6d   : > { %vm1406_vm7 = vcmp.lt.f32.partialorder %v598_v38, 0.5  ;;  %v926_v52 = vadd.f32 -0.25, %v595_v35  ;;  %v927_v53 = vadd.f32 -0.25, %v596_v36  ;;  %v928_v54 = vadd.f32 -0.25, %v597_v37 }
  0x6e   : > { %v929_v55 = vadd.f32 -0.25, %v598_v38  ;;  %v629_v56 = vsub.f32 %v930_v27, %v934_v42  ;;  %v630_v57 = vsub.f32 %v931_v28, %v935_v43  ;;  %v631_v58 = vsub.f32 %v932_v29, %v936_v44 }
  0x6f   : > { %v611_v59 = vsel %vm1392_vm4, %v603_v39, %v926_v52  ;;  %v612_v60 = vsel %vm1396_vm5, %v604_v40, %v927_v53  ;;  %v613_v61 = vsel %vm1400_vm6, %v605_v41, %v928_v54  ;;  %v632_v62 = vsub.f32 %v933_v49, %v937_v50 }
  0x70   : > { %v614_v63 = vsel %vm1406_vm7, %v606_v48, %v929_v55  ;;  %v615_v0 = vadd.f32 %v611_v59, %v577_v22  ;;  %v616_v1 = vadd.f32 %v612_v60, %v578_v25  ;;  %v617_v2 = vadd.f32 %v613_v61, %v579_v26  ;;  %v949_v22 = vld [vmem:[%s1202_s6 + $0xf8] sm:$0xff] }
  0x71   : > { %v618_v6 = vadd.f32 %v614_v63, %v580_v30  ;;  %v633_v7 = vand.u32 2147483647, %v629_v56  ;;  %v634_v8 = vand.u32 2147483647, %v630_v57  ;;  %v635_v9 = vand.u32 2147483647, %v631_v58 }
  0x72   : > { %v636_v10 = vand.u32 2147483647, %v632_v62  ;;  %v641_v11 = vmul.f32 %v629_v56, %v629_v56  ;;  %v642_v12 = vmul.f32 %v630_v57, %v630_v57  ;;  %v643_v13 = vmul.f32 %v631_v58, %v631_v58 }
  0x73   : > { %vm1424_vm8 = vcmp.lt.f32.partialorder %v633_v7, 0.5  ;;  %vm1428_vm9 = vcmp.lt.f32.partialorder %v634_v8, 0.5  ;;  %vm1432_vm10 = vcmp.lt.f32.partialorder %v635_v9, 0.5  ;;  %v644_v20 = vmul.f32 %v632_v62, %v632_v62 }
  0x74   : > { %vm1438_vm11 = vcmp.lt.f32.partialorder %v636_v10, 0.5  ;;  %v938_v26 = vadd.f32 -0.25, %v633_v7  ;;  %v939_v27 = vadd.f32 -0.25, %v634_v8  ;;  %v940_v28 = vadd.f32 -0.25, %v635_v9 }
  0x75   : > { %v941_v29 = vadd.f32 -0.25, %v636_v10  ;;  %v667_v30 = vsub.f32 %v942_v3, %v946_v14  ;;  %v668_v35 = vsub.f32 %v943_v4, %v947_v15  ;;  %v669_v36 = vsub.f32 %v944_v5, %v948_v16 }
  0x76   : > { %v649_v37 = vsel %vm1424_vm8, %v641_v11, %v938_v26  ;;  %v650_v38 = vsel %vm1428_vm9, %v642_v12, %v939_v27  ;;  %v651_v39 = vsel %vm1432_vm10, %v643_v13, %v940_v28  ;;  %v670_v40 = vsub.f32 %v945_v21, %v949_v22 }
  0x77   : > { %v652_v41 = vsel %vm1438_vm11, %v644_v20, %v941_v29  ;;  %v653_v42 = vadd.f32 %v649_v37, %v615_v0  ;;  %v654_v43 = vadd.f32 %v650_v38, %v616_v1  ;;  %v655_v44 = vadd.f32 %v651_v39, %v617_v2 }
  0x78   : > { %v656_v45 = vadd.f32 %v652_v41, %v618_v6  ;;  %v671_v46 = vand.u32 2147483647, %v667_v30  ;;  %v672_v47 = vand.u32 2147483647, %v668_v35  ;;  %v673_v48 = vand.u32 2147483647, %v669_v36 }
  0x79   : > { %v674_v49 = vand.u32 2147483647, %v670_v40  ;;  %v679_v50 = vmul.f32 %v667_v30, %v667_v30  ;;  %v680_v51 = vmul.f32 %v668_v35, %v668_v35  ;;  %v681_v52 = vmul.f32 %v669_v36, %v669_v36 }
  0x7a   : > { %vm1450_vm12 = vcmp.lt.f32.partialorder %v671_v46, 0.5  ;;  %vm1454_vm13 = vcmp.lt.f32.partialorder %v672_v47, 0.5  ;;  %vm1458_vm14 = vcmp.lt.f32.partialorder %v673_v48, 0.5  ;;  %v682_v56 = vmul.f32 %v670_v40, %v670_v40 }
  0x7b   : > { %vm678_vm15 = vcmp.lt.f32.partialorder %v674_v49, 0.5  ;;  %v950_v57 = vadd.f32 -0.25, %v671_v46  ;;  %v951_v58 = vadd.f32 -0.25, %v672_v47  ;;  %v952_v59 = vadd.f32 -0.25, %v673_v48 }
  0x7c   : > { %v391_v60 = vcvt.s32.f32 %v1222_v31  ;;  %v953_v61 = vadd.f32 -0.25, %v674_v49  ;;  %v709_v62 = vadd.f32 %v390_v34, %v389_v33  ;;  %v392_v63 = vcvt.s32.f32 %v1224_v32 }
  0x7d   : > { %v687_v0 = vsel %vm1450_vm12, %v679_v50, %v950_v57  ;;  %v688_v1 = vsel %vm1454_vm13, %v680_v51, %v951_v58  ;;  %v689_v2 = vsel %vm1458_vm14, %v681_v52, %v952_v59 }
  0x7e   : > { %v690_v3 = vsel %vm678_vm15, %v682_v56, %v953_v61  ;;  %v691_v31 = vadd.f32 %v687_v0, %v653_v42  ;;  %v692_v4 = vadd.f32 %v688_v1, %v654_v43  ;;  %v693_v5 = vadd.f32 %v689_v2, %v655_v44 }
  0x7f   : > { %v694_v6 = vadd.f32 %v690_v3, %v656_v45  ;;  %v710_v7 = vadd.f32 %v709_v62, %v391_v60 }
  0x80   : > { %v695_v32 = vmul.f32 %v691_v31, %v389_v33  ;;  %v696_v8 = vmul.f32 %v692_v4, %v390_v34  ;;  %v697_v9 = vmul.f32 %v693_v5, %v391_v60 }
  0x81   : > { %v711_v10 = vadd.f32 %v710_v7, %v392_v63  ;;  %v698_v11 = vmul.f32 %v694_v6, %v392_v63 }
  0x82   : > { %v699_v12 = vadd.f32 %v696_v8, %v695_v32 }
  0x83   : > { %v712_v13 = vrot.slane %v711_v10, 4 }
  0x84   : > { %v700_v14 = vadd.f32 %v699_v12, %v697_v9 }
  0x85   : > { %v713_v15 = vadd.f32 %v712_v13, %v711_v10 }
  0x86   : > { %v701_v16 = vadd.f32 %v700_v14, %v698_v11 }
  0x87   : > { %v714_v17 = vrot.slane %v713_v15, 2 }
  0x88   : > { %v702_v18 = vrot.slane %v701_v16, 4 }
  0x89   : > { %v715_v19 = vadd.f32 %v714_v17, %v713_v15 }
  0x8a   : > { %v703_v20 = vadd.f32 %v702_v18, %v701_v16 }
  0x8b   : > { %v716_v21 = vrot.slane %v715_v19, 1 }
  0x8c   : > { %v704_v23 = vrot.slane %v703_v20, 2 }
  0x8d   : > { %v717_v24 = vadd.f32 %v716_v21, %v715_v19 }
  0x8e   : > { %v705_v33 = vadd.f32 %v704_v23, %v703_v20 }
  0x8f   : > { %718 = vst [vmem:[%s373_s27] sm:$0x1] %v717_v24 }
  0x90   : > { %v706_v34 = vrot.slane %v705_v33, 1 }
  0x92   : > { %v707_v22 = vadd.f32 %v706_v34, %v705_v33 }
  0x94   : > { %708 = vst [vmem:[%s370_s22] sm:$0x1] %v707_v22 }
  0x95 PF: > { %p18_p12 = scmp.ge.s32.totalorder %s1119_s20, 4   ;;  %s1568_s15 = smov %s1050_s16 }
  0x96   : > { %s1569_s16 = smov %s1054_s17  ;;  %s1570_s17 = smov %s1129_s23 }
  0x97   : > { %s1571_s18 = smov %s1119_s20  ;;  %20 = sbr.rel (!%p18_p12) target bundleno = 5 (0x5), region = 168 }
  0x9e   :  { %748 = vsyncpa [#allocation3], 1 }
  0x9f   :  { %750 = vsyncpa [#allocation3 + $0x1], 1 }
  0xa0   :  { %751 = vsyncpa [#allocation5], 1 }
  0xa1   :  { %753 = vsyncpa [#allocation5 + $0x1], 1 }

</bundles_post_ra>
